<compile_context>
chip_gen: v7x
topology: tpu7x:2x2x1
jax: 0.10.0
libtpu: 0.0.40
codegen_flags: <defaults>
</compile_context>

<pallas_src>
import functools

import jax
import jax.numpy as jnp
from jax.experimental import pallas as pl
from jax.experimental.pallas import tpu as pltpu


_TM_MAX = 512      # output-tile rows (multiple of the sublane quantum)
_TK_MAX = 1024     # contraction tile (multiple of 128 lanes)
_LANE = 128
_SUBLANE = 16      # bf16 sublane quantum; legal for f32 tiles as well


def _round_up(x, m):
    return (x + m - 1) // m * m


def _choose_tiling(dim, unit, max_tile):
    """Pad `dim` to a multiple of `unit` (or of `max_tile`) and pick a tile dividing it."""
    padded = _round_up(dim, unit)
    if padded <= max_tile:
        return padded, padded
    return _round_up(dim, max_tile), max_tile


def _matmul_bias_act_kernel(x_ref, w_ref, b_ref, o_ref, acc_ref, *, apply_sigmoid):
    """One (TM, N_pad) output tile: accumulate over the K grid axis, epilogue at k==last."""
    k = pl.program_id(1)

    @pl.when(k == 0)
    def _():
        acc_ref[...] = jnp.zeros_like(acc_ref)

    acc_ref[...] += jnp.dot(x_ref[...], w_ref[...],
                            preferred_element_type=jnp.float32)

    @pl.when(k == pl.num_programs(1) - 1)
    def _():
        acc = acc_ref[...] + b_ref[...]          # bias (f32)
        acc = jnp.maximum(acc, 0.0)              # ReLU (f32 VPU)
        if apply_sigmoid:
            acc = jax.nn.sigmoid(acc)            # EUP; commutes with the final flatten
        o_ref[...] = acc.astype(o_ref.dtype)


def _fused_matmul(x, w, b, *, apply_sigmoid, compute_dtype=jnp.bfloat16):
    """relu(x @ w + b) (optionally followed by sigmoid), tiled over (M, K)."""
    M, K = x.shape
    K2, N = w.shape
    assert K == K2 and b.shape == (N,)

    M_pad, tm = _choose_tiling(M, _SUBLANE, _TM_MAX)
    K_pad, tk = _choose_tiling(K, _LANE, _TK_MAX)
    N_pad = _round_up(N, _LANE)                  # lane-dense output: no masked stores

    x_p = jnp.pad(x, ((0, M_pad - M), (0, K_pad - K))).astype(compute_dtype)
    w_p = jnp.pad(w, ((0, K_pad - K), (0, N_pad - N))).astype(compute_dtype)
    b_p = jnp.pad(b, ((0, N_pad - N),)).astype(jnp.float32).reshape(1, N_pad)

    kern = functools.partial(_matmul_bias_act_kernel, apply_sigmoid=apply_sigmoid)
    out = pl.pallas_call(
        kern,
        out_shape=jax.ShapeDtypeStruct((M_pad, N_pad), jnp.float32),
        grid_spec=pltpu.PrefetchScalarGridSpec(
            num_scalar_prefetch=0,
            grid=(M_pad // tm, K_pad // tk),
            in_specs=[
                pl.BlockSpec((tm, tk), lambda i, k: (i, k)),
                pl.BlockSpec((tk, N_pad), lambda i, k: (k, 0)),
                pl.BlockSpec((1, N_pad), lambda i, k: (0, 0)),
            ],
            out_specs=pl.BlockSpec((tm, N_pad), lambda i, k: (i, 0)),
            scratch_shapes=[pltpu.VMEM((tm, N_pad), jnp.float32)],
        ),
        compiler_params=pltpu.CompilerParams(
            dimension_semantics=("parallel", "arbitrary"),
            vmem_limit_bytes=48 * 1024 * 1024,   # headroom even on v7x's 64 MiB VMEM
        ),
    )(x_p, w_p, b_p)
    return out[:M, :N]


def _im2col_3d(x_ndhwc, k=3, stride=2, pad=1):
    """(B,D,H,W,C) -> patches (B*Do*Ho*Wo, k^3*C), K ordered (kd, kh, kw, cin)."""
    B, D, H, W, C = x_ndhwc.shape
    xp = jnp.pad(x_ndhwc, ((0, 0), (pad, pad), (pad, pad), (pad, pad), (0, 0)))
    Do = (D + 2 * pad - k) // stride + 1
    Ho = (H + 2 * pad - k) // stride + 1
    Wo = (W + 2 * pad - k) // stride + 1
    slices = []
    for kd in range(k):
        for kh in range(k):
            for kw in range(k):
                slices.append(
                    xp[:,
                       kd:kd + stride * Do:stride,
                       kh:kh + stride * Ho:stride,
                       kw:kw + stride * Wo:stride, :])
    pat = jnp.stack(slices, axis=4)                        # (B, Do, Ho, Wo, 27, C)
    pat = pat.reshape(B * Do * Ho * Wo, k * k * k * C)
    return pat, (B, Do, Ho, Wo)


def _conv3d_relu(x_ndhwc, weight, bias, *, apply_sigmoid=False,
                 compute_dtype=jnp.bfloat16):
    """Conv3d(k=3,s=2,p=1)+bias+ReLU(+sigmoid), channels-last in and out.

    `weight` keeps the PyTorch layout (Cout, Cin, kd, kh, kw)."""
    Cout, Cin = weight.shape[0], weight.shape[1]
    patches, (B, Do, Ho, Wo) = _im2col_3d(x_ndhwc)
    w_mat = jnp.transpose(weight, (2, 3, 4, 1, 0)).reshape(27 * Cin, Cout)
    out = _fused_matmul(patches, w_mat, bias,
                        apply_sigmoid=apply_sigmoid, compute_dtype=compute_dtype)
    return out.reshape(B, Do, Ho, Wo, Cout)                # stays channels-last


@functools.partial(jax.jit, static_argnames=("compute_dtype",))
def conv_domain_discriminator_forward(x_ncdhw, params, compute_dtype=jnp.bfloat16):
    """Matches ConvDomainDiscriminator.forward: relu(conv1), relu(conv2), flatten, sigmoid."""
    x = jnp.transpose(x_ncdhw, (0, 2, 3, 4, 1))            # single NCDHW -> NDHWC permute
    h = _conv3d_relu(x, params["w1"], params["b1"],
                     apply_sigmoid=False, compute_dtype=compute_dtype)
    h = _conv3d_relu(h, params["w2"], params["b2"],
                     apply_sigmoid=True, compute_dtype=compute_dtype)
    # Permute the tiny final activation back to channel-first once, so the flatten
    # matches torch's x.view(B, -1) on an NCDHW tensor (sigmoid already applied in-kernel).
    h = jnp.transpose(h, (0, 4, 1, 2, 3))
    return h.reshape(h.shape[0], -1)


def _ref_forward(x, params):
    """Pure-JAX reference using lax.conv (f32, HIGHEST precision) for correctness checks."""
    def conv(x, w, b):
        out = jax.lax.conv_general_dilated(
            x, w, window_strides=(2, 2, 2),
            padding=((1, 1), (1, 1), (1, 1)),
            dimension_numbers=("NCDHW", "OIDHW", "NCDHW"),
            precision=jax.lax.Precision.HIGHEST)
        return jax.nn.relu(out + b.reshape(1, -1, 1, 1, 1))

    h = conv(x, params["w1"], params["b1"])
    h = conv(h, params["w2"], params["b2"])
    return jax.nn.sigmoid(h.reshape(h.shape[0], -1))


if __name__ == "__main__":
    # Small shapes consistent with the module: batch=2, in_channels=4,
    # spatial feature_dim=8 (8 -> 4 -> 2 after two stride-2 convs), hidden=32.
    B, Cin, S, hidden = 2, 4, 8, 32

    key = jax.random.PRNGKey(0)
    k_x, k_w1, k_b1, k_w2, k_b2 = jax.random.split(key, 5)

    x = jax.random.normal(k_x, (B, Cin, S, S, S), dtype=jnp.float32)
    params = {
        "w1": jax.random.normal(k_w1, (hidden, Cin, 3, 3, 3), jnp.float32) / jnp.sqrt(Cin * 27.0),
        "b1": jax.random.normal(k_b1, (hidden,), jnp.float32) * 0.01,
        "w2": jax.random.normal(k_w2, (hidden, hidden, 3, 3, 3), jnp.float32) / jnp.sqrt(hidden * 27.0),
        "b2": jax.random.normal(k_b2, (hidden,), jnp.float32) * 0.01,
    }

    ref = _ref_forward(x, params)

    # f32 MXU-operand path: tight check against the lax.conv reference.
    out_f32 = jax.block_until_ready(
        conv_domain_discriminator_forward(x, params, compute_dtype=jnp.float32))
    assert out_f32.shape == (B, hidden * (S // 4) ** 3), out_f32.shape
    f32_err = float(jnp.max(jnp.abs(out_f32 - ref)))
    assert jnp.allclose(out_f32, ref, atol=2e-3, rtol=2e-3), f"f32 max abs err {f32_err}"

    # bf16 MXU-operand path (default / fast): f32 accumulation + f32 epilogue; bf16 operand
    # rounding needs a looser tolerance vs the f32 HIGHEST reference.
    out_bf16 = jax.block_until_ready(conv_domain_discriminator_forward(x, params))
    assert out_bf16.shape == ref.shape, out_bf16.shape
    max_err = float(jnp.max(jnp.abs(out_bf16 - ref)))
    mean_err = float(jnp.mean(jnp.abs(out_bf16 - ref)))
    assert max_err < 2e-2 and mean_err < 5e-3, (max_err, mean_err)

    print("KERNEL_OK")
</pallas_src>

<mosaic_0001>
module attributes {stable_mosaic.version = 11 : i64} {
  func.func @_matmul_bias_act_kernel(%arg0: i32, %arg1: i32, %arg2: memref<128x128xf32, #tpu.memory_space<vmem>>, %arg3: memref<128x128xf32, #tpu.memory_space<vmem>>, %arg4: memref<1x128xf32, #tpu.memory_space<vmem>>, %arg5: memref<128x128xf32, #tpu.memory_space<vmem>>, %arg6: memref<128x128xf32, #tpu.memory_space<vmem>>) attributes {dimension_semantics = [#tpu.dimension_semantics<parallel>, #tpu.dimension_semantics<arbitrary>], iteration_bounds = array<i64: 1, 1>, scalar_prefetch = 0 : i64, scratch_operands = 1 : i64, tpu.core_type = #tpu.core_type<tc>, window_params = [{transform_indices = @transform_0, window_bounds = array<i64: 128, 128>}, {transform_indices = @transform_1, window_bounds = array<i64: 128, 128>}, {pipeline_mode = #tpu.pipeline_mode<synchronous>, transform_indices = @transform_2, window_bounds = array<i64: 1, 128>}, {transform_indices = @transform_3, window_bounds = array<i64: 128, 128>}]} {
    %c0_i32 = arith.constant 0 : i32
    %0 = arith.cmpi eq, %arg1, %c0_i32 : i32
    %1 = arith.extui %0 : i1 to i32
    %c0_i32_0 = arith.constant 0 : i32
    %2 = arith.cmpi ne, %1, %c0_i32_0 : i32
    scf.if %2 {
      %cst_10 = arith.constant 0.000000e+00 : f32
      %12 = vector.broadcast %cst_10 : f32 to vector<128x128xf32>
      %c0_11 = arith.constant 0 : index
      %c0_12 = arith.constant 0 : index
      %13 = vector.load %arg6[%c0_11, %c0_12] : memref<128x128xf32, #tpu.memory_space<vmem>>, vector<128x128xf32>
      tpu.vector_store %arg6[%c0_11, %c0_12], %12 {strides = array<i32>} : memref<128x128xf32, #tpu.memory_space<vmem>>, vector<128x128xf32>,
    } else {
    }
    %c0 = arith.constant 0 : index
    %c0_1 = arith.constant 0 : index
    %3 = vector.load %arg6[%c0, %c0_1] : memref<128x128xf32, #tpu.memory_space<vmem>>, vector<128x128xf32>
    %c0_2 = arith.constant 0 : index
    %c0_3 = arith.constant 0 : index
    %4 = vector.load %arg2[%c0_2, %c0_3] : memref<128x128xf32, #tpu.memory_space<vmem>>, vector<128x128xf32>
    %c0_4 = arith.constant 0 : index
    %c0_5 = arith.constant 0 : index
    %5 = vector.load %arg3[%c0_4, %c0_5] : memref<128x128xf32, #tpu.memory_space<vmem>>, vector<128x128xf32>
    %cst = arith.constant dense<0.000000e+00> : vector<128x128xf32>
    %6 = tpu.matmul %4, %5, %cst {dimension_numbers = #tpu.dot_dimension_numbers<[1], [0], [0], [1], [0, 0, 1, 1], [], []>} : vector<128x128xf32>, vector<128x128xf32>, vector<128x128xf32> -> vector<128x128xf32>
    %7 = arith.addf %3, %6 : vector<128x128xf32>
    %c0_6 = arith.constant 0 : index
    %c0_7 = arith.constant 0 : index
    %8 = vector.load %arg6[%c0_6, %c0_7] : memref<128x128xf32, #tpu.memory_space<vmem>>, vector<128x128xf32>
    tpu.vector_store %arg6[%c0_6, %c0_7], %7 {strides = array<i32>} : memref<128x128xf32, #tpu.memory_space<vmem>>, vector<128x128xf32>,
    %c0_i32_8 = arith.constant 0 : i32
    %9 = arith.cmpi eq, %arg1, %c0_i32_8 : i32
    %10 = arith.extui %9 : i1 to i32
    %c0_i32_9 = arith.constant 0 : i32
    %11 = arith.cmpi ne, %10, %c0_i32_9 : i32
    scf.if %11 {
      %c0_10 = arith.constant 0 : index
      %c0_11 = arith.constant 0 : index
      %12 = vector.load %arg6[%c0_10, %c0_11] : memref<128x128xf32, #tpu.memory_space<vmem>>, vector<128x128xf32>
      %c0_12 = arith.constant 0 : index
      %c0_13 = arith.constant 0 : index
      %13 = vector.load %arg4[%c0_12, %c0_13] : memref<1x128xf32, #tpu.memory_space<vmem>>, vector<1x128xf32>
      %14 = vector.broadcast %13 : vector<1x128xf32> to vector<128x128xf32>
      %15 = arith.addf %12, %14 : vector<128x128xf32>
      %cst_14 = arith.constant 0.000000e+00 : f32
      %16 = vector.broadcast %cst_14 : f32 to vector<128x128xf32>
      %17 = arith.maximumf %15, %16 : vector<128x128xf32>
      %c0_15 = arith.constant 0 : index
      %c0_16 = arith.constant 0 : index
      %18 = vector.load %arg5[%c0_15, %c0_16] : memref<128x128xf32, #tpu.memory_space<vmem>>, vector<128x128xf32>
      tpu.vector_store %arg5[%c0_15, %c0_16], %17 {strides = array<i32>} : memref<128x128xf32, #tpu.memory_space<vmem>>, vector<128x128xf32>,
    } else {
    }
    return
  }
  func.func @transform_0(%arg0: i32, %arg1: i32) -> (i32, i32) {
    %c0_i32 = arith.constant 0 : i32
    return %arg0, %arg1 : i32, i32
  }
  func.func @transform_1(%arg0: i32, %arg1: i32) -> (i32, i32) {
    %c0_i32 = arith.constant 0 : i32
    %c0_i32_0 = arith.constant 0 : i32
    return %arg1, %c0_i32 : i32, i32
  }
  func.func @transform_2(%arg0: i32, %arg1: i32) -> (i32, i32) {
    %c0_i32 = arith.constant 0 : i32
    %c0_i32_0 = arith.constant 0 : i32
    %c0_i32_1 = arith.constant 0 : i32
    return %c0_i32, %c0_i32_0 : i32, i32
  }
  func.func @transform_3(%arg0: i32, %arg1: i32) -> (i32, i32) {
    %c0_i32 = arith.constant 0 : i32
    %c0_i32_0 = arith.constant 0 : i32
    return %arg0, %c0_i32 : i32, i32
  }
}

module attributes {stable_mosaic.version = 11 : i64} {
  func.func @_matmul_bias_act_kernel(%arg0: i32, %arg1: i32, %arg2: memref<16x896xf32, #tpu.memory_space<vmem>>, %arg3: memref<896x128xf32, #tpu.memory_space<vmem>>, %arg4: memref<1x128xf32, #tpu.memory_space<vmem>>, %arg5: memref<16x128xf32, #tpu.memory_space<vmem>>, %arg6: memref<16x128xf32, #tpu.memory_space<vmem>>) attributes {dimension_semantics = [#tpu.dimension_semantics<parallel>, #tpu.dimension_semantics<arbitrary>], iteration_bounds = array<i64: 1, 1>, scalar_prefetch = 0 : i64, scratch_operands = 1 : i64, tpu.core_type = #tpu.core_type<tc>, window_params = [{transform_indices = @transform_0, window_bounds = array<i64: 16, 896>}, {transform_indices = @transform_1, window_bounds = array<i64: 896, 128>}, {pipeline_mode = #tpu.pipeline_mode<synchronous>, transform_indices = @transform_2, window_bounds = array<i64: 1, 128>}, {transform_indices = @transform_3, window_bounds = array<i64: 16, 128>}]} {
    %c0_i32 = arith.constant 0 : i32
    %0 = arith.cmpi eq, %arg1, %c0_i32 : i32
    %1 = arith.extui %0 : i1 to i32
    %c0_i32_0 = arith.constant 0 : i32
    %2 = arith.cmpi ne, %1, %c0_i32_0 : i32
    scf.if %2 {
      %cst_10 = arith.constant 0.000000e+00 : f32
      %12 = vector.broadcast %cst_10 : f32 to vector<16x128xf32>
      %c0_11 = arith.constant 0 : index
      %c0_12 = arith.constant 0 : index
      %13 = vector.load %arg6[%c0_11, %c0_12] : memref<16x128xf32, #tpu.memory_space<vmem>>, vector<16x128xf32>
      tpu.vector_store %arg6[%c0_11, %c0_12], %12 {strides = array<i32>} : memref<16x128xf32, #tpu.memory_space<vmem>>, vector<16x128xf32>,
    } else {
    }
    %c0 = arith.constant 0 : index
    %c0_1 = arith.constant 0 : index
    %3 = vector.load %arg6[%c0, %c0_1] : memref<16x128xf32, #tpu.memory_space<vmem>>, vector<16x128xf32>
    %c0_2 = arith.constant 0 : index
    %c0_3 = arith.constant 0 : index
    %4 = vector.load %arg2[%c0_2, %c0_3] : memref<16x896xf32, #tpu.memory_space<vmem>>, vector<16x896xf32>
    %c0_4 = arith.constant 0 : index
    %c0_5 = arith.constant 0 : index
    %5 = vector.load %arg3[%c0_4, %c0_5] : memref<896x128xf32, #tpu.memory_space<vmem>>, vector<896x128xf32>
    %cst = arith.constant dense<0.000000e+00> : vector<16x128xf32>
    %6 = tpu.matmul %4, %5, %cst {dimension_numbers = #tpu.dot_dimension_numbers<[1], [0], [0], [1], [0, 0, 1, 1], [], []>} : vector<16x896xf32>, vector<896x128xf32>, vector<16x128xf32> -> vector<16x128xf32>
    %7 = arith.addf %3, %6 : vector<16x128xf32>
    %c0_6 = arith.constant 0 : index
    %c0_7 = arith.constant 0 : index
    %8 = vector.load %arg6[%c0_6, %c0_7] : memref<16x128xf32, #tpu.memory_space<vmem>>, vector<16x128xf32>
    tpu.vector_store %arg6[%c0_6, %c0_7], %7 {strides = array<i32>} : memref<16x128xf32, #tpu.memory_space<vmem>>, vector<16x128xf32>,
    %c0_i32_8 = arith.constant 0 : i32
    %9 = arith.cmpi eq, %arg1, %c0_i32_8 : i32
    %10 = arith.extui %9 : i1 to i32
    %c0_i32_9 = arith.constant 0 : i32
    %11 = arith.cmpi ne, %10, %c0_i32_9 : i32
    scf.if %11 {
      %c0_10 = arith.constant 0 : index
      %c0_11 = arith.constant 0 : index
      %12 = vector.load %arg6[%c0_10, %c0_11] : memref<16x128xf32, #tpu.memory_space<vmem>>, vector<16x128xf32>
      %c0_12 = arith.constant 0 : index
      %c0_13 = arith.constant 0 : index
      %13 = vector.load %arg4[%c0_12, %c0_13] : memref<1x128xf32, #tpu.memory_space<vmem>>, vector<1x128xf32>
      %14 = vector.broadcast %13 : vector<1x128xf32> to vector<16x128xf32>
      %15 = arith.addf %12, %14 : vector<16x128xf32>
      %cst_14 = arith.constant 0.000000e+00 : f32
      %16 = vector.broadcast %cst_14 : f32 to vector<16x128xf32>
      %17 = arith.maximumf %15, %16 : vector<16x128xf32>
      %18 = arith.negf %17 : vector<16x128xf32>
      %19 = math.exp %18 : vector<16x128xf32>
      %cst_15 = arith.constant 1.000000e+00 : f32
      %20 = vector.broadcast %cst_15 : f32 to vector<16x128xf32>
      %21 = arith.addf %20, %19 : vector<16x128xf32>
      %22 = arith.divf %20, %21 : vector<16x128xf32>
      %c0_16 = arith.constant 0 : index
      %c0_17 = arith.constant 0 : index
      %23 = vector.load %arg5[%c0_16, %c0_17] : memref<16x128xf32, #tpu.memory_space<vmem>>, vector<16x128xf32>
      tpu.vector_store %arg5[%c0_16, %c0_17], %22 {strides = array<i32>} : memref<16x128xf32, #tpu.memory_space<vmem>>, vector<16x128xf32>,
    } else {
    }
    return
  }
  func.func @transform_0(%arg0: i32, %arg1: i32) -> (i32, i32) {
    %c0_i32 = arith.constant 0 : i32
    return %arg0, %arg1 : i32, i32
  }
  func.func @transform_1(%arg0: i32, %arg1: i32) -> (i32, i32) {
    %c0_i32 = arith.constant 0 : i32
    %c0_i32_0 = arith.constant 0 : i32
    return %arg1, %c0_i32 : i32, i32
  }
  func.func @transform_2(%arg0: i32, %arg1: i32) -> (i32, i32) {
    %c0_i32 = arith.constant 0 : i32
    %c0_i32_0 = arith.constant 0 : i32
    %c0_i32_1 = arith.constant 0 : i32
    return %c0_i32, %c0_i32_0 : i32, i32
  }
  func.func @transform_3(%arg0: i32, %arg1: i32) -> (i32, i32) {
    %c0_i32 = arith.constant 0 : i32
    %c0_i32_0 = arith.constant 0 : i32
    return %arg0, %c0_i32 : i32, i32
  }
}

</mosaic_0001>

<bundles_post_ra>
// kernel: conv_domain_discriminator_forward.2
= control target key start
LH: loop header
LB: loop body
LE: loop exit
PB: predicated region body
PF: predicated region fallthrough
CT: control target
= control target key end

     0   :  { %s641_s1 = inlined_call_operand.vmem [shape: f32[128,128], index: 1, kind: input, shape index: {}]   ;;  %s642_s0 = inlined_call_operand.vmem [shape: f32[128,128], index: 0, kind: input, shape index: {}]   ;;  %s643_s2 = inlined_call_operand.vmem [shape: f32[1,128], index: 2, kind: input, shape index: {}]   ;;  %s644_s3 = inlined_call_operand.vmem [shape: f32[128,128], index: 3, kind: output, shape index: {}]  }
   0x1   :  { %v66_v0 = vld [vmem:[%s641_s1] sm:$0xff]  ;;  %v67_v1 = vld [vmem:[%s641_s1 + $0x8] sm:$0xff]  ;;  %v68_v2 = vld [vmem:[%s641_s1 + $0x10] sm:$0xff] }
   0x2   :  { %v426_v3 = vpack.c.bf16 %v67_v1, %v66_v0  ;;  %v69_v4 = vld [vmem:[%s641_s1 + $0x18] sm:$0xff]  ;;  %v70_v6 = vld [vmem:[%s641_s1 + $0x20] sm:$0xff]  ;;  %v71_v7 = vld [vmem:[%s641_s1 + $0x28] sm:$0xff] }
   0x3   :  { %v430_v5 = vpack.c.bf16 %v69_v4, %v68_v2  ;;  %v434_v8 = vpack.c.bf16 %v71_v7, %v70_v6  ;;  %v50_v9 = vld [vmem:[%s642_s0] sm:$0xff]  ;;  %v72_v11 = vld [vmem:[%s641_s1 + $0x30] sm:$0xff]  ;;  %v73_v12 = vld [vmem:[%s641_s1 + $0x38] sm:$0xff] }
   0x4   :  { %427 = vmatprep.subr.bf16.mxu0 %v426_v3  ;;  %458 = vmatprep.subr.bf16.mxu1 %v426_v3  ;;  %v58_v10 = vld [vmem:[%s642_s0 + $0x40] sm:$0xff]  ;;  %v438_v13 = vpack.c.bf16 %v73_v12, %v72_v11  ;;  %v75_v15 = vld [vmem:[%s641_s1 + $0x48] sm:$0xff]  ;;  %v76_v17 = vld [vmem:[%s641_s1 + $0x50] sm:$0xff] }
   0x5   :  { %429 = vmatpush3.bf16.msra.mxu0 %v426_v3  ;;  %466 = vmatpush3.bf16.msra.mxu1 %v426_v3  ;;  %v74_v14 = vld [vmem:[%s641_s1 + $0x40] sm:$0xff]  ;;  %v77_v18 = vld [vmem:[%s641_s1 + $0x58] sm:$0xff]  ;;  %v79_v21 = vld [vmem:[%s641_s1 + $0x68] sm:$0xff] }
   0x6   :  { %431 = vmatprep.subr.bf16.mxu0 %v430_v5  ;;  %459 = vmatprep.subr.bf16.mxu1 %v430_v5  ;;  %v442_v16 = vpack.c.bf16 %v75_v15, %v74_v14  ;;  %v446_v19 = vpack.c.bf16 %v77_v18, %v76_v17  ;;  %v78_v20 = vld [vmem:[%s641_s1 + $0x60] sm:$0xff]  ;;  %v80_v23 = vld [vmem:[%s641_s1 + $0x70] sm:$0xff]  ;;  %v81_v24 = vld [vmem:[%s641_s1 + $0x78] sm:$0xff] }
   0x7   :  { %402 = vmatprep.mubr.f32.mxu0 %v50_v9  ;;  %414 = vmatprep.mubr.f32.mxu1 %v58_v10  ;;  %v450_v22 = vpack.c.bf16 %v79_v21, %v78_v20  ;;  %v454_v25 = vpack.c.bf16 %v81_v24, %v80_v23  ;;  %v51_v26 = vld [vmem:[%s642_s0 + $0x8] sm:$0xff]  ;;  %v52_v28 = vld [vmem:[%s642_s0 + $0x10] sm:$0xff]  ;;  %v53_v30 = vld [vmem:[%s642_s0 + $0x18] sm:$0xff] }
   0x8   :  { %v59_v27 = vld [vmem:[%s642_s0 + $0x48] sm:$0xff]  ;;  %v60_v29 = vld [vmem:[%s642_s0 + $0x50] sm:$0xff]  ;;  %v61_v31 = vld [vmem:[%s642_s0 + $0x58] sm:$0xff] }
   0x9   :  { %433 = vmatpush3.bf16.msra.mxu0 %v430_v5  ;;  %467 = vmatpush3.bf16.msra.mxu1 %v430_v5  ;;  %v54_v32 = vld [vmem:[%s642_s0 + $0x20] sm:$0xff]  ;;  %v55_v34 = vld [vmem:[%s642_s0 + $0x28] sm:$0xff]  ;;  %v56_v36 = vld [vmem:[%s642_s0 + $0x30] sm:$0xff] }
   0xa   :  { %435 = vmatprep.subr.bf16.mxu0 %v434_v8  ;;  %460 = vmatprep.subr.bf16.mxu1 %v434_v8  ;;  %v62_v33 = vld [vmem:[%s642_s0 + $0x60] sm:$0xff]  ;;  %v63_v35 = vld [vmem:[%s642_s0 + $0x68] sm:$0xff]  ;;  %v64_v37 = vld [vmem:[%s642_s0 + $0x70] sm:$0xff] }
   0xb   :  { %v57_v38 = vld [vmem:[%s642_s0 + $0x38] sm:$0xff]  ;;  %v337_v40 = vld [vmem:[%s643_s2] ss:$0 sm:$0xff] }
   0xc   :  { %v65_v39 = vld [vmem:[%s642_s0 + $0x78] sm:$0xff] }
   0xd   :  { %437 = vmatpush3.bf16.msra.mxu0 %v434_v8  ;;  %468 = vmatpush3.bf16.msra.mxu1 %v434_v8 }
   0xe   :  { %439 = vmatprep.subr.bf16.mxu0 %v438_v13  ;;  %461 = vmatprep.subr.bf16.mxu1 %v438_v13 }
  0x11   :  { %441 = vmatpush3.bf16.msra.mxu0 %v438_v13  ;;  %469 = vmatpush3.bf16.msra.mxu1 %v438_v13 }
  0x12   :  { %443 = vmatprep.subr.bf16.mxu0 %v442_v16  ;;  %462 = vmatprep.subr.bf16.mxu1 %v442_v16 }
  0x15   :  { %445 = vmatpush3.bf16.msra.mxu0 %v442_v16  ;;  %470 = vmatpush3.bf16.msra.mxu1 %v442_v16 }
  0x16   :  { %447 = vmatprep.subr.bf16.mxu0 %v446_v19  ;;  %463 = vmatprep.subr.bf16.mxu1 %v446_v19 }
  0x19   :  { %449 = vmatpush3.bf16.msra.mxu0 %v446_v19  ;;  %471 = vmatpush3.bf16.msra.mxu1 %v446_v19 }
  0x1a   :  { %451 = vmatprep.subr.bf16.mxu0 %v450_v22  ;;  %464 = vmatprep.subr.bf16.mxu1 %v450_v22 }
  0x1d   :  { %453 = vmatpush3.bf16.msra.mxu0 %v450_v22  ;;  %472 = vmatpush3.bf16.msra.mxu1 %v450_v22 }
  0x1e   :  { %455 = vmatprep.subr.bf16.mxu0 %v454_v25  ;;  %465 = vmatprep.subr.bf16.mxu1 %v454_v25 }
  0x21   :  { %457 = vmatpush3.bf16.msra.mxu0 %v454_v25  ;;  %473 = vmatpush3.bf16.msra.mxu1 %v454_v25 }
  0x24   :  { %403 = vmatmul.mubr.f32.vlgmr.msra.gmra.mrb[0].mxu0 %v51_v26  ;;  %415 = vmatmul.mubr.f32.vlgmr.msra.gmra.mrb[0].mxu1 %v59_v27 }
  0x25   :  { %405 = vmatprep.mubr.f32.mxu0 %v52_v28  ;;  %417 = vmatprep.mubr.f32.mxu1 %v60_v29 }
  0x28   :  { %406 = vmatmul.mubr.f32.gmra.mrb[2].mxu0 %v53_v30  ;;  %418 = vmatmul.mubr.f32.gmra.mrb[2].mxu1 %v61_v31 }
  0x29   :  { %408 = vmatprep.mubr.f32.mxu0 %v54_v32  ;;  %420 = vmatprep.mubr.f32.mxu1 %v62_v33 }
  0x2c   :  { %409 = vmatmul.mubr.f32.gmra.mrb[4].mxu0 %v55_v34  ;;  %421 = vmatmul.mubr.f32.gmra.mrb[4].mxu1 %v63_v35 }
  0x2d   :  { %411 = vmatprep.mubr.f32.mxu0 %v56_v36  ;;  %423 = vmatprep.mubr.f32.mxu1 %v64_v37 }
  0x30   :  { %412 = vmatmul.mubr.f32.gmra.mrb[6].mxu0 %v57_v38  ;;  %424 = vmatmul.mubr.f32.gmra.mrb[6].mxu1 %v65_v39 }
  0xf7   :  { %v404_v41 = vpop.f32.mrb[0].mxu0  ;;  %v416_v42 = vpop.f32.mrb[0].mxu1 }
  0xf8   :  { %v286_v43 = vadd.f32 %v404_v41, %v337_v40  ;;  %v294_v44 = vadd.f32 %v416_v42, %v337_v40  ;;  %v148_v45 = vpop.f32.mrb[1].mxu0  ;;  %v188_v46 = vpop.f32.mrb[1].mxu1 }
  0xf9   :  { %v285_v47 = vadd.f32 %v337_v40, %v148_v45  ;;  %v293_v48 = vadd.f32 %v337_v40, %v188_v46 }
  0xfa   :  { %v302_v49 = vmax.f32 %v286_v43, 0.0  ;;  %v310_v50 = vmax.f32 %v294_v44, 0.0 }
  0xfb   :  { %v301_v51 = vmax.f32 %v285_v47, 0.0  ;;  %v309_v52 = vmax.f32 %v293_v48, 0.0  ;;  %v407_v53 = vpop.f32.mrb[2].mxu0  ;;  %v419_v54 = vpop.f32.mrb[2].mxu1 }
  0xfc   :  { %318 = vst [vmem:[%s644_s3 + $0x8] sm:$0xff] %v302_v49  ;;  %326 = vst [vmem:[%s644_s3 + $0x48] sm:$0xff] %v310_v50  ;;  %v288_v55 = vadd.f32 %v407_v53, %v337_v40  ;;  %v296_v56 = vadd.f32 %v419_v54, %v337_v40  ;;  %v158_v57 = vpop.f32.mrb[3].mxu0  ;;  %v198_v58 = vpop.f32.mrb[3].mxu1 }
  0xfd   :  { %317 = vst [vmem:[%s644_s3] sm:$0xff] %v301_v51  ;;  %325 = vst [vmem:[%s644_s3 + $0x40] sm:$0xff] %v309_v52  ;;  %v287_v59 = vadd.f32 %v337_v40, %v158_v57  ;;  %v295_v60 = vadd.f32 %v337_v40, %v198_v58 }
  0xfe   :  { %v304_v61 = vmax.f32 %v288_v55, 0.0  ;;  %v312_v62 = vmax.f32 %v296_v56, 0.0 }
  0xff   :  { %v303_v63 = vmax.f32 %v287_v59, 0.0  ;;  %v311_v0 = vmax.f32 %v295_v60, 0.0  ;;  %v410_v1 = vpop.f32.mrb[4].mxu0  ;;  %v422_v2 = vpop.f32.mrb[4].mxu1 }
 0x100   :  { %320 = vst [vmem:[%s644_s3 + $0x18] sm:$0xff] %v304_v61  ;;  %328 = vst [vmem:[%s644_s3 + $0x58] sm:$0xff] %v312_v62  ;;  %v290_v3 = vadd.f32 %v410_v1, %v337_v40  ;;  %v298_v4 = vadd.f32 %v422_v2, %v337_v40  ;;  %v168_v5 = vpop.f32.mrb[5].mxu0  ;;  %v208_v6 = vpop.f32.mrb[5].mxu1 }
 0x101   :  { %319 = vst [vmem:[%s644_s3 + $0x10] sm:$0xff] %v303_v63  ;;  %327 = vst [vmem:[%s644_s3 + $0x50] sm:$0xff] %v311_v0  ;;  %v289_v7 = vadd.f32 %v337_v40, %v168_v5  ;;  %v297_v8 = vadd.f32 %v337_v40, %v208_v6 }
 0x102   :  { %v306_v9 = vmax.f32 %v290_v3, 0.0  ;;  %v314_v10 = vmax.f32 %v298_v4, 0.0 }
 0x103   :  { %v305_v11 = vmax.f32 %v289_v7, 0.0  ;;  %v313_v12 = vmax.f32 %v297_v8, 0.0  ;;  %v413_v13 = vpop.f32.mrb[6].mxu0  ;;  %v425_v14 = vpop.f32.mrb[6].mxu1 }
 0x104   :  { %322 = vst [vmem:[%s644_s3 + $0x28] sm:$0xff] %v306_v9  ;;  %330 = vst [vmem:[%s644_s3 + $0x68] sm:$0xff] %v314_v10  ;;  %v292_v15 = vadd.f32 %v413_v13, %v337_v40  ;;  %v300_v16 = vadd.f32 %v425_v14, %v337_v40  ;;  %v178_v17 = vpop.f32.mrb[7].mxu0  ;;  %v218_v18 = vpop.f32.mrb[7].mxu1 }
 0x105   :  { %321 = vst [vmem:[%s644_s3 + $0x20] sm:$0xff] %v305_v11  ;;  %329 = vst [vmem:[%s644_s3 + $0x60] sm:$0xff] %v313_v12  ;;  %v291_v19 = vadd.f32 %v337_v40, %v178_v17  ;;  %v299_v20 = vadd.f32 %v337_v40, %v218_v18 }
 0x106   :  { %v308_v21 = vmax.f32 %v292_v15, 0.0  ;;  %v316_v22 = vmax.f32 %v300_v16, 0.0 }
 0x107   :  { %v307_v23 = vmax.f32 %v291_v19, 0.0  ;;  %v315_v24 = vmax.f32 %v299_v20, 0.0 }
 0x108   :  { %324 = vst [vmem:[%s644_s3 + $0x38] sm:$0xff] %v308_v21  ;;  %332 = vst [vmem:[%s644_s3 + $0x78] sm:$0xff] %v316_v22 }
 0x109   :  { %323 = vst [vmem:[%s644_s3 + $0x30] sm:$0xff] %v307_v23  ;;  %331 = vst [vmem:[%s644_s3 + $0x70] sm:$0xff] %v315_v24 }

// kernel: conv_domain_discriminator_forward.3
= control target key start
LH: loop header
LB: loop body
LE: loop exit
PB: predicated region body
PF: predicated region fallthrough
CT: control target
= control target key end

     0   :  { %s1199_s1 = inlined_call_operand.vmem [shape: f32[896,128], index: 1, kind: input, shape index: {}]   ;;  %s1200_s0 = inlined_call_operand.vmem [shape: f32[16,896], index: 0, kind: input, shape index: {}]   ;;  %s1201_s2 = inlined_call_operand.vmem [shape: f32[1,128], index: 2, kind: input, shape index: {}]   ;;  %s1202_s3 = inlined_call_operand.vmem [shape: f32[16,128], index: 3, kind: output, shape index: {}]  }
   0x1   :  { %v52_v0 = vld [vmem:[%s1199_s1 + $0x80] sm:$0xff]  ;;  %v53_v1 = vld [vmem:[%s1199_s1 + $0x88] sm:$0xff]  ;;  %v54_v11 = vld [vmem:[%s1199_s1 + $0x90] sm:$0xff] }
   0x2   :  { %v84_v2 = vld [vmem:[%s1199_s1 + $0x180] sm:$0xff]  ;;  %v656_v3 = vpack.c.bf16 %v53_v1, %v52_v0  ;;  %v85_v4 = vld [vmem:[%s1199_s1 + $0x188] sm:$0xff]  ;;  %v55_v13 = vld [vmem:[%s1199_s1 + $0x98] sm:$0xff] }
   0x3   :  { %v36_v5 = vld [vmem:[%s1199_s1] sm:$0xff]  ;;  %v37_v6 = vld [vmem:[%s1199_s1 + $0x8] sm:$0xff]  ;;  %v688_v7 = vpack.c.bf16 %v85_v4, %v84_v2  ;;  %v86_v14 = vld [vmem:[%s1199_s1 + $0x190] sm:$0xff]  ;;  %v660_v16 = vpack.c.bf16 %v55_v13, %v54_v11 }
   0x4   :  { %v658_v8 = vpack.c.bf16 %v37_v6, %v36_v5  ;;  %v68_v9 = vld [vmem:[%s1199_s1 + $0x100] sm:$0xff]  ;;  %v69_v10 = vld [vmem:[%s1199_s1 + $0x108] sm:$0xff]  ;;  %657 = vmatprep.subr.bf16.mxu0 %v656_v3  ;;  %v87_v15 = vld [vmem:[%s1199_s1 + $0x198] sm:$0xff] }
   0x5   :  { %v690_v12 = vpack.c.bf16 %v69_v10, %v68_v9  ;;  %689 = vmatprep.subr.bf16.mxu1 %v688_v7  ;;  %v692_v17 = vpack.c.bf16 %v87_v15, %v86_v14  ;;  %v38_v18 = vld [vmem:[%s1199_s1 + $0x10] sm:$0xff]  ;;  %v39_v19 = vld [vmem:[%s1199_s1 + $0x18] sm:$0xff]  ;;  %v56_v23 = vld [vmem:[%s1199_s1 + $0xa0] sm:$0xff] }
   0x6   :  { %659 = vmatpush3.bf16.msra.mxu0 %v658_v8  ;;  %v70_v20 = vld [vmem:[%s1199_s1 + $0x110] sm:$0xff]  ;;  %v662_v21 = vpack.c.bf16 %v39_v19, %v38_v18  ;;  %v71_v22 = vld [vmem:[%s1199_s1 + $0x118] sm:$0xff]  ;;  %v57_v24 = vld [vmem:[%s1199_s1 + $0xa8] sm:$0xff] }
   0x7   :  { %691 = vmatpush3.bf16.msra.mxu1 %v690_v12  ;;  %661 = vmatprep.subr.bf16.mxu0 %v660_v16  ;;  %v694_v25 = vpack.c.bf16 %v71_v22, %v70_v20  ;;  %v664_v26 = vpack.c.bf16 %v57_v24, %v56_v23  ;;  %v88_v27 = vld [vmem:[%s1199_s1 + $0x1a0] sm:$0xff]  ;;  %v89_v28 = vld [vmem:[%s1199_s1 + $0x1a8] sm:$0xff]  ;;  %v58_v35 = vld [vmem:[%s1199_s1 + $0xb0] sm:$0xff] }
   0x8   :  { %693 = vmatprep.subr.bf16.mxu1 %v692_v17  ;;  %v40_v29 = vld [vmem:[%s1199_s1 + $0x20] sm:$0xff]  ;;  %v696_v30 = vpack.c.bf16 %v89_v28, %v88_v27  ;;  %v41_v31 = vld [vmem:[%s1199_s1 + $0x28] sm:$0xff]  ;;  %v59_v36 = vld [vmem:[%s1199_s1 + $0xb8] sm:$0xff] }
   0x9   :  { %v72_v32 = vld [vmem:[%s1199_s1 + $0x120] sm:$0xff]  ;;  %v73_v33 = vld [vmem:[%s1199_s1 + $0x128] sm:$0xff]  ;;  %v666_v34 = vpack.c.bf16 %v41_v31, %v40_v29  ;;  %v90_v37 = vld [vmem:[%s1199_s1 + $0x1b0] sm:$0xff]  ;;  %v668_v39 = vpack.c.bf16 %v59_v36, %v58_v35 }
   0xa   :  { %663 = vmatpush3.bf16.msra.mxu0 %v662_v21  ;;  %v698_v38 = vpack.c.bf16 %v73_v33, %v72_v32  ;;  %v91_v40 = vld [vmem:[%s1199_s1 + $0x1b8] sm:$0xff]  ;;  %v42_v41 = vld [vmem:[%s1199_s1 + $0x30] sm:$0xff]  ;;  %v60_v46 = vld [vmem:[%s1199_s1 + $0xc0] sm:$0xff] }
   0xb   :  { %695 = vmatpush3.bf16.msra.mxu1 %v694_v25  ;;  %665 = vmatprep.subr.bf16.mxu0 %v664_v26  ;;  %v43_v42 = vld [vmem:[%s1199_s1 + $0x38] sm:$0xff]  ;;  %v700_v43 = vpack.c.bf16 %v91_v40, %v90_v37  ;;  %v74_v44 = vld [vmem:[%s1199_s1 + $0x130] sm:$0xff]  ;;  %v61_v47 = vld [vmem:[%s1199_s1 + $0xc8] sm:$0xff] }
   0xc   :  { %697 = vmatprep.subr.bf16.mxu1 %v696_v30  ;;  %v75_v45 = vld [vmem:[%s1199_s1 + $0x138] sm:$0xff]  ;;  %v92_v48 = vld [vmem:[%s1199_s1 + $0x1c0] sm:$0xff]  ;;  %v93_v49 = vld [vmem:[%s1199_s1 + $0x1c8] sm:$0xff]  ;;  %v670_v50 = vpack.c.bf16 %v43_v42, %v42_v41  ;;  %v672_v52 = vpack.c.bf16 %v61_v47, %v60_v46 }
   0xd   :  { %v702_v51 = vpack.c.bf16 %v75_v45, %v74_v44  ;;  %v44_v53 = vld [vmem:[%s1199_s1 + $0x40] sm:$0xff]  ;;  %v45_v54 = vld [vmem:[%s1199_s1 + $0x48] sm:$0xff]  ;;  %v704_v56 = vpack.c.bf16 %v93_v49, %v92_v48  ;;  %v62_v58 = vld [vmem:[%s1199_s1 + $0xd0] sm:$0xff] }
   0xe   :  { %667 = vmatpush3.bf16.msra.mxu0 %v666_v34  ;;  %v76_v55 = vld [vmem:[%s1199_s1 + $0x140] sm:$0xff]  ;;  %v77_v57 = vld [vmem:[%s1199_s1 + $0x148] sm:$0xff]  ;;  %v63_v59 = vld [vmem:[%s1199_s1 + $0xd8] sm:$0xff]  ;;  %v674_v62 = vpack.c.bf16 %v45_v54, %v44_v53 }
   0xf   :  { %699 = vmatpush3.bf16.msra.mxu1 %v698_v38  ;;  %669 = vmatprep.subr.bf16.mxu0 %v668_v39  ;;  %v94_v60 = vld [vmem:[%s1199_s1 + $0x1d0] sm:$0xff]  ;;  %v95_v61 = vld [vmem:[%s1199_s1 + $0x1d8] sm:$0xff]  ;;  %v706_v63 = vpack.c.bf16 %v77_v57, %v76_v55  ;;  %v676_v0 = vpack.c.bf16 %v63_v59, %v62_v58  ;;  %v64_v6 = vld [vmem:[%s1199_s1 + $0xe0] sm:$0xff] }
  0x10   :  { %701 = vmatprep.subr.bf16.mxu1 %v700_v43  ;;  %v46_v1 = vld [vmem:[%s1199_s1 + $0x50] sm:$0xff]  ;;  %v47_v2 = vld [vmem:[%s1199_s1 + $0x58] sm:$0xff]  ;;  %v708_v4 = vpack.c.bf16 %v95_v61, %v94_v60  ;;  %v65_v7 = vld [vmem:[%s1199_s1 + $0xe8] sm:$0xff] }
  0x11   :  { %v78_v3 = vld [vmem:[%s1199_s1 + $0x150] sm:$0xff]  ;;  %v79_v5 = vld [vmem:[%s1199_s1 + $0x158] sm:$0xff]  ;;  %v96_v8 = vld [vmem:[%s1199_s1 + $0x1e0] sm:$0xff]  ;;  %v678_v10 = vpack.c.bf16 %v47_v2, %v46_v1  ;;  %v680_v14 = vpack.c.bf16 %v65_v7, %v64_v6 }
  0x12   :  { %671 = vmatpush3.bf16.msra.mxu0 %v670_v50  ;;  %v97_v9 = vld [vmem:[%s1199_s1 + $0x1e8] sm:$0xff]  ;;  %v48_v11 = vld [vmem:[%s1199_s1 + $0x60] sm:$0xff]  ;;  %v710_v13 = vpack.c.bf16 %v79_v5, %v78_v3  ;;  %v25_v17 = vld [vmem:[%s1200_s0 + $0x18] sm:$0xff] }
  0x13   :  { %703 = vmatpush3.bf16.msra.mxu1 %v702_v51  ;;  %673 = vmatprep.subr.bf16.mxu0 %v672_v52  ;;  %v49_v12 = vld [vmem:[%s1199_s1 + $0x68] sm:$0xff]  ;;  %v80_v15 = vld [vmem:[%s1199_s1 + $0x160] sm:$0xff]  ;;  %v712_v18 = vpack.c.bf16 %v97_v9, %v96_v8  ;;  %v66_v20 = vld [vmem:[%s1199_s1 + $0xf0] sm:$0xff] }
  0x14   :  { %705 = vmatprep.subr.bf16.mxu1 %v704_v56  ;;  %v23_v16 = vld [vmem:[%s1200_s0 + $0x8] sm:$0xff]  ;;  %v67_v21 = vld [vmem:[%s1199_s1 + $0xf8] sm:$0xff]  ;;  %v98_v22 = vld [vmem:[%s1199_s1 + $0x1f0] sm:$0xff]  ;;  %287 = vmatprep.mubr.f32.mxu1 %v25_v17  ;;  %v682_v24 = vpack.c.bf16 %v49_v12, %v48_v11 }
  0x15   :  { %v81_v19 = vld [vmem:[%s1199_s1 + $0x168] sm:$0xff]  ;;  %212 = vmatprep.mubr.f32.mxu0 %v23_v16  ;;  %v99_v23 = vld [vmem:[%s1199_s1 + $0x1f8] sm:$0xff]  ;;  %v684_v26 = vpack.c.bf16 %v67_v21, %v66_v20  ;;  %v50_v27 = vld [vmem:[%s1199_s1 + $0x70] sm:$0xff] }
  0x16   :  { %675 = vmatpush3.bf16.msra.mxu0 %v674_v62  ;;  %v714_v25 = vpack.c.bf16 %v81_v19, %v80_v15  ;;  %v51_v28 = vld [vmem:[%s1199_s1 + $0x78] sm:$0xff]  ;;  %v82_v29 = vld [vmem:[%s1199_s1 + $0x170] sm:$0xff]  ;;  %v716_v30 = vpack.c.bf16 %v99_v23, %v98_v22  ;;  %v116_v32 = vld [vmem:[%s1199_s1 + $0x280] sm:$0xff] }
  0x17   :  { %707 = vmatpush3.bf16.msra.mxu1 %v706_v63  ;;  %677 = vmatprep.subr.bf16.mxu0 %v676_v0  ;;  %v83_v31 = vld [vmem:[%s1199_s1 + $0x178] sm:$0xff]  ;;  %v117_v33 = vld [vmem:[%s1199_s1 + $0x288] sm:$0xff]  ;;  %v132_v34 = vld [vmem:[%s1199_s1 + $0x300] sm:$0xff]  ;;  %v686_v36 = vpack.c.bf16 %v51_v28, %v50_v27 }
  0x18   :  { %709 = vmatprep.subr.bf16.mxu1 %v708_v4  ;;  %v133_v35 = vld [vmem:[%s1199_s1 + $0x308] sm:$0xff]  ;;  %v718_v37 = vpack.c.bf16 %v83_v31, %v82_v29  ;;  %v720_v38 = vpack.c.bf16 %v117_v33, %v116_v32  ;;  %v100_v39 = vld [vmem:[%s1199_s1 + $0x200] sm:$0xff]  ;;  %v118_v41 = vld [vmem:[%s1199_s1 + $0x290] sm:$0xff] }
  0x19   :  { %v101_v40 = vld [vmem:[%s1199_s1 + $0x208] sm:$0xff]  ;;  %v119_v42 = vld [vmem:[%s1199_s1 + $0x298] sm:$0xff]  ;;  %v752_v43 = vpack.c.bf16 %v133_v35, %v132_v34  ;;  %v134_v44 = vld [vmem:[%s1199_s1 + $0x310] sm:$0xff] }
  0x1a   :  { %679 = vmatpush3.bf16.msra.mxu0 %v678_v10  ;;  %v135_v45 = vld [vmem:[%s1199_s1 + $0x318] sm:$0xff]  ;;  %v22_v46 = vld [vmem:[%s1200_s0] sm:$0xff]  ;;  %v722_v47 = vpack.c.bf16 %v101_v40, %v100_v39  ;;  %v24_v48 = vld [vmem:[%s1200_s0 + $0x10] sm:$0xff]  ;;  %v724_v49 = vpack.c.bf16 %v119_v42, %v118_v41 }
  0x1b   :  { %711 = vmatpush3.bf16.msra.mxu1 %v710_v13  ;;  %681 = vmatprep.subr.bf16.mxu0 %v680_v14  ;;  %v102_v50 = vld [vmem:[%s1199_s1 + $0x210] sm:$0xff]  ;;  %v103_v51 = vld [vmem:[%s1199_s1 + $0x218] sm:$0xff]  ;;  %v120_v52 = vld [vmem:[%s1199_s1 + $0x2a0] sm:$0xff]  ;;  %v756_v54 = vpack.c.bf16 %v135_v45, %v134_v44 }
  0x1c   :  { %713 = vmatprep.subr.bf16.mxu1 %v712_v18  ;;  %v121_v53 = vld [vmem:[%s1199_s1 + $0x2a8] sm:$0xff]  ;;  %v136_v55 = vld [vmem:[%s1199_s1 + $0x320] sm:$0xff]  ;;  %v726_v57 = vpack.c.bf16 %v103_v51, %v102_v50  ;;  %v32_v59 = vld [vmem:[%s1200_s0 + $0x50] sm:$0xff] }
  0x1d   :  { %v137_v56 = vld [vmem:[%s1199_s1 + $0x328] sm:$0xff]  ;;  %v30_v58 = vld [vmem:[%s1200_s0 + $0x40] sm:$0xff]  ;;  %v29_v60 = vld [vmem:[%s1200_s0 + $0x38] sm:$0xff]  ;;  %v728_v61 = vpack.c.bf16 %v121_v53, %v120_v52 }
  0x1e   :  { %683 = vmatpush3.bf16.msra.mxu0 %v682_v24  ;;  %v104_v62 = vld [vmem:[%s1199_s1 + $0x220] sm:$0xff]  ;;  %v105_v63 = vld [vmem:[%s1199_s1 + $0x228] sm:$0xff]  ;;  %v122_v1 = vld [vmem:[%s1199_s1 + $0x2b0] sm:$0xff]  ;;  %v760_v3 = vpack.c.bf16 %v137_v56, %v136_v55 }
  0x1f   :  { %715 = vmatpush3.bf16.msra.mxu1 %v714_v25  ;;  %685 = vmatprep.subr.bf16.mxu0 %v684_v26  ;;  %v31_v0 = vld [vmem:[%s1200_s0 + $0x48] sm:$0xff]  ;;  %v123_v2 = vld [vmem:[%s1199_s1 + $0x2b8] sm:$0xff]  ;;  %v138_v4 = vld [vmem:[%s1199_s1 + $0x330] sm:$0xff]  ;;  %v730_v7 = vpack.c.bf16 %v105_v63, %v104_v62 }
  0x20   :  { %717 = vmatprep.subr.bf16.mxu1 %v716_v30  ;;  %v139_v5 = vld [vmem:[%s1199_s1 + $0x338] sm:$0xff]  ;;  %v27_v6 = vld [vmem:[%s1200_s0 + $0x28] sm:$0xff]  ;;  %v732_v8 = vpack.c.bf16 %v123_v2, %v122_v1  ;;  %v106_v9 = vld [vmem:[%s1199_s1 + $0x230] sm:$0xff] }
  0x21   :  { %v107_v10 = vld [vmem:[%s1199_s1 + $0x238] sm:$0xff]  ;;  %v28_v11 = vld [vmem:[%s1200_s0 + $0x30] sm:$0xff]  ;;  %v124_v12 = vld [vmem:[%s1199_s1 + $0x2c0] sm:$0xff]  ;;  %v764_v14 = vpack.c.bf16 %v139_v5, %v138_v4 }
  0x22   :  { %687 = vmatpush3.bf16.msra.mxu0 %v686_v36  ;;  %v125_v13 = vld [vmem:[%s1199_s1 + $0x2c8] sm:$0xff]  ;;  %v140_v15 = vld [vmem:[%s1199_s1 + $0x340] sm:$0xff]  ;;  %v734_v17 = vpack.c.bf16 %v107_v10, %v106_v9  ;;  %v126_v21 = vld [vmem:[%s1199_s1 + $0x2d0] sm:$0xff] }
  0x23   :  { %719 = vmatpush3.bf16.msra.mxu1 %v718_v37  ;;  %721 = vmatprep.subr.bf16.mxu0 %v720_v38  ;;  %v141_v16 = vld [vmem:[%s1199_s1 + $0x348] sm:$0xff]  ;;  %v736_v18 = vpack.c.bf16 %v125_v13, %v124_v12  ;;  %v108_v19 = vld [vmem:[%s1199_s1 + $0x240] sm:$0xff]  ;;  %v127_v22 = vld [vmem:[%s1199_s1 + $0x2d8] sm:$0xff] }
  0x24   :  { %753 = vmatprep.subr.bf16.mxu1 %v752_v43  ;;  %v109_v20 = vld [vmem:[%s1199_s1 + $0x248] sm:$0xff]  ;;  %v768_v23 = vpack.c.bf16 %v141_v16, %v140_v15  ;;  %v142_v24 = vld [vmem:[%s1199_s1 + $0x350] sm:$0xff]  ;;  %v143_v25 = vld [vmem:[%s1199_s1 + $0x358] sm:$0xff]  ;;  %v740_v27 = vpack.c.bf16 %v127_v22, %v126_v21 }
  0x25   :  { %213 = vmatmul.mubr.f32.vlgmr.msra.gmra.mrb[0].mxu0 %v22_v46  ;;  %v738_v26 = vpack.c.bf16 %v109_v20, %v108_v19  ;;  %v110_v28 = vld [vmem:[%s1199_s1 + $0x250] sm:$0xff]  ;;  %v111_v29 = vld [vmem:[%s1199_s1 + $0x258] sm:$0xff]  ;;  %v128_v30 = vld [vmem:[%s1199_s1 + $0x2e0] sm:$0xff]  ;;  %v772_v32 = vpack.c.bf16 %v143_v25, %v142_v24 }
  0x26   :  { %288 = vmatmul.mubr.f32.vlgmr.msra.gmra.mrb[0].mxu1 %v24_v48  ;;  %723 = vmatpush3.bf16.msra.mxu0 %v722_v47  ;;  %v129_v31 = vld [vmem:[%s1199_s1 + $0x2e8] sm:$0xff]  ;;  %v144_v33 = vld [vmem:[%s1199_s1 + $0x360] sm:$0xff]  ;;  %v742_v35 = vpack.c.bf16 %v111_v29, %v110_v28  ;;  %v130_v39 = vld [vmem:[%s1199_s1 + $0x2f0] sm:$0xff] }
  0x27   :  { %725 = vmatprep.subr.bf16.mxu0 %v724_v49  ;;  %755 = vmatpush3.bf16.msra.mxu1 %v752_v43  ;;  %v145_v34 = vld [vmem:[%s1199_s1 + $0x368] sm:$0xff]  ;;  %v744_v36 = vpack.c.bf16 %v129_v31, %v128_v30  ;;  %v112_v37 = vld [vmem:[%s1199_s1 + $0x260] sm:$0xff]  ;;  %v131_v40 = vld [vmem:[%s1199_s1 + $0x2f8] sm:$0xff] }
  0x28   :  { %757 = vmatprep.subr.bf16.mxu1 %v756_v54  ;;  %217 = vmatprep.mubr.f32.mxu0 %v30_v58  ;;  %v113_v38 = vld [vmem:[%s1199_s1 + $0x268] sm:$0xff]  ;;  %v776_v41 = vpack.c.bf16 %v145_v34, %v144_v33  ;;  %v146_v42 = vld [vmem:[%s1199_s1 + $0x370] sm:$0xff]  ;;  %v147_v43 = vld [vmem:[%s1199_s1 + $0x378] sm:$0xff]  ;;  %v748_v45 = vpack.c.bf16 %v131_v40, %v130_v39 }
  0x29   :  { %292 = vmatprep.mubr.f32.mxu1 %v32_v59  ;;  %218 = vmatmul.mubr.f32.gmra.mrb[2].mxu0 %v29_v60  ;;  %v746_v44 = vpack.c.bf16 %v113_v38, %v112_v37  ;;  %v114_v46 = vld [vmem:[%s1199_s1 + $0x270] sm:$0xff]  ;;  %v115_v47 = vld [vmem:[%s1199_s1 + $0x278] sm:$0xff]  ;;  %v780_v48 = vpack.c.bf16 %v147_v43, %v146_v42  ;;  %v26_v50 = vld [vmem:[%s1200_s0 + $0x20] sm:$0xff] }
  0x2a   :  { %727 = vmatpush3.bf16.msra.mxu0 %v726_v57  ;;  %293 = vmatmul.mubr.f32.gmra.mrb[2].mxu1 %v31_v0  ;;  %v750_v49 = vpack.c.bf16 %v115_v47, %v114_v46  ;;  %v34_v51 = vld [vmem:[%s1200_s0 + $0x60] sm:$0xff]  ;;  %v35_v52 = vld [vmem:[%s1200_s0 + $0x68] sm:$0xff]  ;;  %v33_v53 = vld [vmem:[%s1200_s0 + $0x58] sm:$0xff] }
  0x2b   :  { %729 = vmatprep.subr.bf16.mxu0 %v728_v61  ;;  %759 = vmatpush3.bf16.msra.mxu1 %v756_v54  ;;  %v486_v12 = vld [vmem:[%s1201_s2] ss:$0 sm:$0xff] }
  0x2c   :  { %761 = vmatprep.subr.bf16.mxu1 %v760_v3  ;;  %362 = vmatprep.mubr.f32.mxu0 %v27_v6 }
  0x2d   :  { %653 = vmatprep.mubr.f32.mxu1 %v28_v11 }
  0x2e   :  { %731 = vmatpush3.bf16.msra.mxu0 %v730_v7 }
  0x2f   :  { %733 = vmatprep.subr.bf16.mxu0 %v732_v8  ;;  %763 = vmatpush3.bf16.msra.mxu1 %v760_v3 }
  0x30   :  { %765 = vmatprep.subr.bf16.mxu1 %v764_v14 }
  0x32   :  { %735 = vmatpush3.bf16.msra.mxu0 %v734_v17 }
  0x33   :  { %737 = vmatprep.subr.bf16.mxu0 %v736_v18  ;;  %767 = vmatpush3.bf16.msra.mxu1 %v764_v14 }
  0x34   :  { %769 = vmatprep.subr.bf16.mxu1 %v768_v23 }
  0x36   :  { %739 = vmatpush3.bf16.msra.mxu0 %v738_v26 }
  0x37   :  { %741 = vmatprep.subr.bf16.mxu0 %v740_v27  ;;  %771 = vmatpush3.bf16.msra.mxu1 %v768_v23 }
  0x38   :  { %773 = vmatprep.subr.bf16.mxu1 %v772_v32 }
  0x3a   :  { %743 = vmatpush3.bf16.msra.mxu0 %v742_v35 }
  0x3b   :  { %745 = vmatprep.subr.bf16.mxu0 %v744_v36  ;;  %775 = vmatpush3.bf16.msra.mxu1 %v772_v32 }
  0x3c   :  { %777 = vmatprep.subr.bf16.mxu1 %v776_v41 }
  0x3e   :  { %747 = vmatpush3.bf16.msra.mxu0 %v746_v44 }
  0x3f   :  { %749 = vmatprep.subr.bf16.mxu0 %v748_v45  ;;  %779 = vmatpush3.bf16.msra.mxu1 %v776_v41 }
  0x40   :  { %781 = vmatprep.subr.bf16.mxu1 %v780_v48 }
  0x42   :  { %751 = vmatpush3.bf16.msra.mxu0 %v750_v49 }
  0x43   :  { %783 = vmatpush3.bf16.msra.mxu1 %v780_v48 }
  0x45   :  { %363 = vmatmul.mubr.f32.vlgmr.msra.gmra.mrb[4].mxu0 %v26_v50 }
  0x46   :  { %367 = vmatprep.mubr.f32.mxu0 %v34_v51  ;;  %654 = vmatmul.mubr.f32.vlgmr.msra.gmra.mrb[4].mxu1 %v35_v52 }
  0x49   :  { %368 = vmatmul.mubr.f32.gmra.mrb[6].mxu0 %v33_v53 }
  0xf8   :  { %v521_v54 = vpop.f32.mrb[0].mxu0 }
  0xf9   :  { %v559_v55 = vpop.f32.mrb[0].mxu1  ;;  %v522_v56 = vpop.f32.mrb[1].mxu0 }
  0xfa   :  { %v523_v57 = vadd.f32 %v522_v56, %v521_v54  ;;  %v560_v58 = vpop.f32.mrb[1].mxu1 }
  0xfb   :  { %v561_v59 = vadd.f32 %v560_v58, %v559_v55 }
  0xfc   :  { %v524_v60 = vpop.f32.mrb[2].mxu0 }
  0xfd   :  { %v290_v61 = vadd.f32 %v561_v59, %v523_v57  ;;  %v562_v62 = vpop.f32.mrb[2].mxu1  ;;  %v525_v63 = vpop.f32.mrb[3].mxu0 }
  0xfe   :  { %v526_v0 = vadd.f32 %v525_v63, %v524_v60  ;;  %v563_v1 = vpop.f32.mrb[3].mxu1 }
  0xff   :  { %v564_v2 = vadd.f32 %v563_v1, %v562_v62 }
 0x101   :  { %v295_v3 = vadd.f32 %v564_v2, %v526_v0 }
 0x118   :  { %v597_v4 = vpop.f32.mrb[4].mxu0 }
 0x119   :  { %v598_v5 = vpop.f32.mrb[5].mxu0  ;;  %v655_v6 = vpop.f32.mrb[4].mxu1 }
 0x11a   :  { %v599_v7 = vadd.f32 %v598_v5, %v597_v4  ;;  %v439_v8 = vpop.f32.mrb[5].mxu1 }
 0x11c   :  { %v600_v9 = vpop.f32.mrb[6].mxu0  ;;  %v365_v10 = vadd.f32 %v599_v7, %v290_v61 }
 0x11d   :  { %v601_v11 = vpop.f32.mrb[7].mxu0 }
 0x11e   :  { %v602_v13 = vadd.f32 %v601_v11, %v600_v9  ;;  %v440_v14 = vadd.f32 %v439_v8, %v365_v10 }
 0x120   :  { %v370_v15 = vadd.f32 %v602_v13, %v295_v3  ;;  %v464_v16 = vadd.f32 %v486_v12, %v440_v14 }
 0x122   :  { %v445_v17 = vadd.f32 %v655_v6, %v370_v15  ;;  %v466_v18 = vmax.f32 %v464_v16, 0.0 }
 0x124   :  { %v465_v19 = vadd.f32 %v486_v12, %v445_v17  ;;  %v487_v20 = vmul.f32 -1.442695, %v466_v18 }
 0x126   :  { %v467_v21 = vmax.f32 %v465_v19, 0.0  ;;  %784 = vpow2.f32 %v487_v20 }
 0x128   :  { %v488_v22 = vmul.f32 -1.442695, %v467_v21 }
 0x12a   :  { %786 = vpow2.f32 %v488_v22 }
 0x130   :  { %v785_v23 = vpop.eup %784 }
 0x131   :  { %v474_v24 = vadd.f32 1.0, %v785_v23 }
 0x133   :  { %788 = vrcp.f32 %v474_v24 }
 0x134   :  { %v787_v25 = vpop.eup %786 }
 0x135   :  { %v475_v26 = vadd.f32 1.0, %v787_v25 }
 0x137   :  { %790 = vrcp.f32 %v475_v26 }
 0x13d   :  { %v789_v27 = vpop.eup %788 }
 0x13e   :  { %480 = vst [vmem:[%s1202_s3] sm:$0xff] %v789_v27 }
 0x141   :  { %v791_v28 = vpop.eup %790 }
 0x142   :  { %481 = vst [vmem:[%s1202_s3 + $0x8] sm:$0xff] %v791_v28 }

</bundles_post_ra>
